<compile_context>
chip_gen: v6e
topology: v6e:2x2x1
jax: 0.10.0
libtpu: 0.0.40
codegen_flags: <defaults>
</compile_context>

<pallas_src>
import functools

import jax
import jax.numpy as jnp
from jax import lax
from jax.experimental import pallas as pl
from jax.experimental.pallas import tpu as pltpu

LANE = 128            # vreg lane width (last dim)
SUBLANE = 8           # vreg sublane rows
MAX_TR = 4096         # max rows per pipelined tile: 4096*128*4 B = 2 MiB f32 / input / buffer
CHUNK_ROWS = 512      # inner-loop chunk rows: bounds live f32 temporaries to ~1.25 MiB
NUM_PAR = 2           # leading "parallel" grid axis (covers v7x's 2 TCs; cheap elsewhere)
SMALL_N = 1 << 20     # below this element count the pure-JAX path beats pallas_call overhead
VMEM_LIMIT_BYTES = 32 * 1024 * 1024   # explicit: > v5e's 16 MiB scoped default, < v7x's 64 MiB


def _round_up(x, m):
    return (x + m - 1) // m * m


def _accum_chunks(p_ref, t_ref, *, chunk, n_chunks, binary_targets,
                  tile_base=None, n_valid=None):
    """Sum the per-element (un-negated) BCE log terms of this tile into an (8,128) f32 block.

    If `n_valid` is given, elements whose flat index (tile_base + offset) >= n_valid are
    zeroed (mask the value, not the inputs, so out-of-bounds garbage never contributes).
    """
    if n_valid is not None:
        # Loop-invariant flat offset of each element within one chunk (hoisted).
        # NOTE: int32 indexing; fine for n < 2**31 elements.
        within = (lax.broadcasted_iota(jnp.int32, (chunk, LANE), 0) * LANE
                  + lax.broadcasted_iota(jnp.int32, (chunk, LANE), 1))

    def body(j, acc):
        r0 = pl.multiple_of(j * chunk, chunk)
        p = p_ref[pl.ds(r0, chunk), :].astype(jnp.float32)
        t = t_ref[pl.ds(r0, chunk), :].astype(jnp.float32)
        if binary_targets:
            # Single transcendental per element (exact only for t in {0,1}).
            val = jnp.maximum(jnp.log(jnp.where(t >= 0.5, p, 1.0 - p)), -100.0)
        else:
            # Exact nn.BCELoss semantics (soft targets OK); log clamp at -100.
            # Rewritten as log1mp + t*(logp - log1mp)  ==  t*logp + (1-t)*log1mp.
            log_p = jnp.maximum(jnp.log(p), -100.0)
            log_1mp = jnp.maximum(jnp.log(1.0 - p), -100.0)
            val = log_1mp + t * (log_p - log_1mp)
        if n_valid is not None:
            elem_idx = (tile_base + r0 * LANE) + within
            val = jnp.where(elem_idx < n_valid, val, 0.0)
        # Fold (chunk,128) down to (8,128) with pure VPU adds; the single cross-lane
        # reduce happens once, in the wrapper, on the tiny partials.
        return acc + jnp.sum(val.reshape(chunk // SUBLANE, SUBLANE, LANE), axis=0)

    return lax.fori_loop(0, n_chunks, body, jnp.zeros((SUBLANE, LANE), jnp.float32))


def _bce_sum_kernel(p_ref, t_ref, o_ref, *, n_valid, tr, chunk, tiles_per_core,
                    binary_targets):
    """Grid = (NUM_PAR, tiles_per_core); axis 0 parallel (per-core partials), axis 1 reduction."""
    c = pl.program_id(0)
    i = pl.program_id(1)

    @pl.when(i == 0)
    def _():
        o_ref[...] = jnp.zeros_like(o_ref)

    n_chunks = tr // chunk
    tile_base = (c * tiles_per_core + i) * (tr * LANE)     # flat index of this logical tile
    tile_complete = (tile_base + tr * LANE) <= n_valid     # no masking needed on this tile

    @pl.when(tile_complete)
    def _():
        o_ref[...] += _accum_chunks(p_ref, t_ref, chunk=chunk, n_chunks=n_chunks,
                                    binary_targets=binary_targets)

    @pl.when(jnp.logical_not(tile_complete))
    def _():
        o_ref[...] += _accum_chunks(p_ref, t_ref, chunk=chunk, n_chunks=n_chunks,
                                    binary_targets=binary_targets,
                                    tile_base=tile_base, n_valid=n_valid)


def _focal_loss_jax(inputs, targets, alpha, gamma):
    p = inputs.astype(jnp.float32)
    t = targets.astype(jnp.float32)
    log_p = jnp.maximum(jnp.log(p), -100.0)
    log_1mp = jnp.maximum(jnp.log(1.0 - p), -100.0)
    bce = jnp.mean(-(t * log_p + (1.0 - t) * log_1mp))
    pt = jnp.exp(-bce)
    focal = jnp.square(1.0 - pt) if gamma == 2 else (1.0 - pt) ** gamma
    return (alpha * focal * bce).astype(jnp.float32)


@functools.partial(jax.jit,
                   static_argnames=("alpha", "gamma", "binary_targets", "use_pallas"))
def focal_loss(inputs, targets, alpha=1.0, gamma=2.0, binary_targets=False,
               use_pallas=None):
    """inputs: probabilities, targets: labels; any shape (e.g. NCHW), any dtype. Scalar f32."""
    n = inputs.size  # static under jit
    if use_pallas is None:
        use_pallas = n >= SMALL_N
    if not use_pallas:
        return _focal_loss_jax(inputs, targets, alpha, gamma)

    flat_p = inputs.reshape(-1)   # free for contiguous arrays
    flat_t = targets.reshape(-1)

    # Only pad when n is not a multiple of 128 (rare; <128 elements, p=t=1 -> exact 0 and
    # additionally masked in kernel).  No padding at all for the per-core / per-tile rounding.
    m = _round_up(n, LANE)
    if m != n:  # static Python check
        pad = m - n
        flat_p = jnp.concatenate([flat_p, jnp.ones((pad,), flat_p.dtype)])
        flat_t = jnp.concatenate([flat_t, jnp.ones((pad,), flat_t.dtype)])

    rows = m // LANE
    p2d = flat_p.reshape(rows, LANE)
    t2d = flat_t.reshape(rows, LANE)

    # --- tiling (static) ----------------------------------------------------------------
    rows_per_core = max(pl.cdiv(rows, NUM_PAR), 1)
    if rows_per_core <= CHUNK_ROWS:
        tr = _round_up(rows_per_core, SUBLANE)
        chunk = tr
    else:
        tr = min(MAX_TR, _round_up(rows_per_core, CHUNK_ROWS))
        chunk = CHUNK_ROWS
    total_tiles = pl.cdiv(rows, tr)
    tiles_per_core = pl.cdiv(total_tiles, NUM_PAR)
    last_tile = total_tiles - 1

    def in_idx(c, i):
        # Clamp fully out-of-range logical tiles onto the last real tile; their contribution
        # is zeroed in-kernel by the element-index mask, and the pipeline skips duplicate
        # fetches for repeated block indices.
        return (jnp.minimum(c * tiles_per_core + i, last_tile), 0)

    kernel = functools.partial(
        _bce_sum_kernel, n_valid=n, tr=tr, chunk=chunk,
        tiles_per_core=tiles_per_core, binary_targets=binary_targets)

    # --- per-core (8,128) partial sums of the un-negated log terms -----------------------
    partials = pl.pallas_call(
        kernel,
        out_shape=jax.ShapeDtypeStruct((NUM_PAR * SUBLANE, LANE), jnp.float32),
        grid=(NUM_PAR, tiles_per_core),
        in_specs=[pl.BlockSpec((tr, LANE), in_idx),
                  pl.BlockSpec((tr, LANE), in_idx)],
        out_specs=pl.BlockSpec((SUBLANE, LANE), lambda c, i: (c, 0)),
        compiler_params=pltpu.CompilerParams(
            dimension_semantics=("parallel", "arbitrary"),
            vmem_limit_bytes=VMEM_LIMIT_BYTES,
        ),
    )(p2d, t2d)

    # --- tiny epilogue on the (16,128) partials ------------------------------------------
    mean_bce = -jnp.sum(partials) / jnp.float32(n)   # single negate here (saved per-element)
    pt = jnp.exp(-mean_bce)
    one_minus_pt = 1.0 - pt
    focal = jnp.square(one_minus_pt) if gamma == 2 else one_minus_pt ** gamma
    return (alpha * focal * mean_bce).astype(jnp.float32)


def _reference(inputs, targets, alpha=1.0, gamma=2.0):
    return _focal_loss_jax(inputs, targets, alpha, gamma)


if __name__ == "__main__":
    key = jax.random.PRNGKey(0)
    shapes = [
        (2, 4, 16, 16),   # demo NCHW shape: lane- and tile-aligned (no pad, no mask)
        (2, 19, 8, 16),   # 128-aligned but tile-unaligned: exercises in-kernel tail masking
        (3, 5, 7, 11),    # not 128-aligned: exercises the tiny lane-pad path + masking
    ]
    for idx, shape in enumerate(shapes):
        k1, k2 = jax.random.split(jax.random.fold_in(key, idx))
        inputs = jax.nn.sigmoid(jax.random.normal(k1, shape, dtype=jnp.float32))   # probs
        targets = (jax.random.uniform(k2, shape) > 0.5).astype(jnp.float32)        # labels
        loss = jax.block_until_ready(focal_loss(inputs, targets, use_pallas=True))
        ref = _reference(inputs, targets)
        assert jnp.allclose(loss, ref, rtol=1e-5, atol=1e-6), (shape, loss, ref)
    print("KERNEL_OK")
</pallas_src>

<mosaic_0001>
module attributes {stable_mosaic.version = 11 : i64} {
  func.func @_bce_sum_kernel(%arg0: i32, %arg1: i32, %arg2: memref<8x128xf32, #tpu.memory_space<vmem>>, %arg3: memref<8x128xf32, #tpu.memory_space<vmem>>, %arg4: memref<8x128xf32, #tpu.memory_space<vmem>>) attributes {dimension_semantics = [#tpu.dimension_semantics<parallel>, #tpu.dimension_semantics<arbitrary>], iteration_bounds = array<i64: 2, 1>, scalar_prefetch = 0 : i64, scratch_operands = 0 : i64, tpu.core_type = #tpu.core_type<tc>, window_params = [{transform_indices = @transform_0, window_bounds = array<i64: 8, 128>}, {transform_indices = @transform_1, window_bounds = array<i64: 8, 128>}, {transform_indices = @transform_2, window_bounds = array<i64: 8, 128>}]} {
    %c0_i32 = arith.constant 0 : i32
    %0 = arith.cmpi eq, %arg1, %c0_i32 : i32
    %1 = arith.extui %0 : i1 to i32
    %c0_i32_0 = arith.constant 0 : i32
    %2 = arith.cmpi ne, %1, %c0_i32_0 : i32
    scf.if %2 {
      %cst = arith.constant 0.000000e+00 : f32
      %13 = vector.broadcast %cst : f32 to vector<8x128xf32>
      %c0 = arith.constant 0 : index
      %c0_4 = arith.constant 0 : index
      %14 = vector.load %arg4[%c0, %c0_4] : memref<8x128xf32, #tpu.memory_space<vmem>>, vector<8x128xf32>
      tpu.vector_store %arg4[%c0, %c0_4], %13 {strides = array<i32>} : memref<8x128xf32, #tpu.memory_space<vmem>>, vector<8x128xf32>,
    } else {
    }
    %c1_i32 = arith.constant 1 : i32
    %3 = arith.muli %arg0, %c1_i32 : i32
    %4 = arith.addi %3, %arg1 : i32
    %c1024_i32 = arith.constant 1024 : i32
    %5 = arith.muli %4, %c1024_i32 : i32
    %c1024_i32_1 = arith.constant 1024 : i32
    %6 = arith.addi %5, %c1024_i32_1 : i32
    %c2048_i32 = arith.constant 2048 : i32
    %7 = arith.cmpi sle, %6, %c2048_i32 : i32
    %8 = arith.extui %7 : i1 to i32
    %c0_i32_2 = arith.constant 0 : i32
    %9 = arith.cmpi ne, %8, %c0_i32_2 : i32
    scf.if %9 {
      %c0 = arith.constant 0 : index
      %c0_4 = arith.constant 0 : index
      %13 = vector.load %arg4[%c0, %c0_4] : memref<8x128xf32, #tpu.memory_space<vmem>>, vector<8x128xf32>
      %cst = arith.constant 0.000000e+00 : f32
      %14 = vector.broadcast %cst : f32 to vector<8x128xf32>
      %c0_i32_5 = arith.constant 0 : i32
      %c8_i32 = arith.constant 8 : i32
      %15 = arith.muli %c0_i32_5, %c8_i32 : i32
      %16 = tpu.assume_multiple %15, 8 : i32
      %17 = arith.index_cast %16 : i32 to index
      %c0_6 = arith.constant 0 : index
      %18 = vector.load %arg2[%17, %c0_6] : memref<8x128xf32, #tpu.memory_space<vmem>>, vector<8x128xf32>
      %19 = arith.index_cast %16 : i32 to index
      %c0_7 = arith.constant 0 : index
      %20 = vector.load %arg3[%19, %c0_7] : memref<8x128xf32, #tpu.memory_space<vmem>>, vector<8x128xf32>
      %21 = math.log %18 : vector<8x128xf32>
      %cst_8 = arith.constant -1.000000e+02 : f32
      %22 = vector.broadcast %cst_8 : f32 to vector<8x128xf32>
      %23 = arith.maximumf %21, %22 : vector<8x128xf32>
      %cst_9 = arith.constant 1.000000e+00 : f32
      %24 = vector.broadcast %cst_9 : f32 to vector<8x128xf32>
      %25 = arith.subf %24, %18 : vector<8x128xf32>
      %26 = math.log %25 : vector<8x128xf32>
      %cst_10 = arith.constant -1.000000e+02 : f32
      %27 = vector.broadcast %cst_10 : f32 to vector<8x128xf32>
      %28 = arith.maximumf %26, %27 : vector<8x128xf32>
      %29 = arith.subf %23, %28 : vector<8x128xf32>
      %30 = arith.mulf %20, %29 : vector<8x128xf32>
      %31 = arith.addf %28, %30 : vector<8x128xf32>
      %32 = vector.shape_cast %31 : vector<8x128xf32> to vector<1x8x128xf32>
      %cst_11 = arith.constant dense<0.000000e+00> : vector<8x128xf32>
      %33 = vector.multi_reduction <add>, %32, %cst_11 [0] : vector<1x8x128xf32> to vector<8x128xf32>
      %34 = arith.addf %14, %33 : vector<8x128xf32>
      %c1_i32_12 = arith.constant 1 : i32
      %35 = arith.addf %13, %34 : vector<8x128xf32>
      %c0_13 = arith.constant 0 : index
      %c0_14 = arith.constant 0 : index
      %36 = vector.load %arg4[%c0_13, %c0_14] : memref<8x128xf32, #tpu.memory_space<vmem>>, vector<8x128xf32>
      tpu.vector_store %arg4[%c0_13, %c0_14], %35 {strides = array<i32>} : memref<8x128xf32, #tpu.memory_space<vmem>>, vector<8x128xf32>,
    } else {
    }
    %true = arith.constant true
    %10 = arith.xori %7, %true : i1
    %11 = arith.extui %10 : i1 to i32
    %c0_i32_3 = arith.constant 0 : i32
    %12 = arith.cmpi ne, %11, %c0_i32_3 : i32
    scf.if %12 {
      %c0 = arith.constant 0 : index
      %c0_4 = arith.constant 0 : index
      %13 = vector.load %arg4[%c0, %c0_4] : memref<8x128xf32, #tpu.memory_space<vmem>>, vector<8x128xf32>
      %14 = tpu.iota {dimensions = array<i32: 0>} : vector<8x128xi32>
      %c128_i32 = arith.constant 128 : i32
      %15 = vector.broadcast %c128_i32 : i32 to vector<8x128xi32>
      %16 = arith.muli %14, %15 : vector<8x128xi32>
      %17 = tpu.iota {dimensions = array<i32: 1>} : vector<8x128xi32>
      %18 = arith.addi %16, %17 : vector<8x128xi32>
      %cst = arith.constant 0.000000e+00 : f32
      %19 = vector.broadcast %cst : f32 to vector<8x128xf32>
      %c0_i32_5 = arith.constant 0 : i32
      %c8_i32 = arith.constant 8 : i32
      %20 = arith.muli %c0_i32_5, %c8_i32 : i32
      %21 = tpu.assume_multiple %20, 8 : i32
      %22 = arith.index_cast %21 : i32 to index
      %c0_6 = arith.constant 0 : index
      %23 = vector.load %arg2[%22, %c0_6] : memref<8x128xf32, #tpu.memory_space<vmem>>, vector<8x128xf32>
      %24 = arith.index_cast %21 : i32 to index
      %c0_7 = arith.constant 0 : index
      %25 = vector.load %arg3[%24, %c0_7] : memref<8x128xf32, #tpu.memory_space<vmem>>, vector<8x128xf32>
      %26 = math.log %23 : vector<8x128xf32>
      %cst_8 = arith.constant -1.000000e+02 : f32
      %27 = vector.broadcast %cst_8 : f32 to vector<8x128xf32>
      %28 = arith.maximumf %26, %27 : vector<8x128xf32>
      %cst_9 = arith.constant 1.000000e+00 : f32
      %29 = vector.broadcast %cst_9 : f32 to vector<8x128xf32>
      %30 = arith.subf %29, %23 : vector<8x128xf32>
      %31 = math.log %30 : vector<8x128xf32>
      %cst_10 = arith.constant -1.000000e+02 : f32
      %32 = vector.broadcast %cst_10 : f32 to vector<8x128xf32>
      %33 = arith.maximumf %31, %32 : vector<8x128xf32>
      %34 = arith.subf %28, %33 : vector<8x128xf32>
      %35 = arith.mulf %25, %34 : vector<8x128xf32>
      %36 = arith.addf %33, %35 : vector<8x128xf32>
      %c128_i32_11 = arith.constant 128 : i32
      %37 = arith.muli %21, %c128_i32_11 : i32
      %38 = arith.addi %5, %37 : i32
      %39 = vector.broadcast %38 : i32 to vector<8x128xi32>
      %40 = arith.addi %39, %18 : vector<8x128xi32>
      %c2048_i32_12 = arith.constant 2048 : i32
      %41 = vector.broadcast %c2048_i32_12 : i32 to vector<8x128xi32>
      %42 = arith.cmpi slt, %40, %41 : vector<8x128xi32>
      %cst_13 = arith.constant 0.000000e+00 : f32
      %43 = vector.broadcast %cst_13 : f32 to vector<8x128xf32>
      %44 = arith.select %42, %36, %43 : vector<8x128xi1>, vector<8x128xf32>
      %45 = vector.shape_cast %44 : vector<8x128xf32> to vector<1x8x128xf32>
      %cst_14 = arith.constant dense<0.000000e+00> : vector<8x128xf32>
      %46 = vector.multi_reduction <add>, %45, %cst_14 [0] : vector<1x8x128xf32> to vector<8x128xf32>
      %47 = arith.addf %19, %46 : vector<8x128xf32>
      %c1_i32_15 = arith.constant 1 : i32
      %48 = arith.addf %13, %47 : vector<8x128xf32>
      %c0_16 = arith.constant 0 : index
      %c0_17 = arith.constant 0 : index
      %49 = vector.load %arg4[%c0_16, %c0_17] : memref<8x128xf32, #tpu.memory_space<vmem>>, vector<8x128xf32>
      tpu.vector_store %arg4[%c0_16, %c0_17], %48 {strides = array<i32>} : memref<8x128xf32, #tpu.memory_space<vmem>>, vector<8x128xf32>,
    } else {
    }
    return
  }
  func.func @transform_0(%arg0: i32, %arg1: i32) -> (i32, i32) {
    %c1_i32 = arith.constant 1 : i32
    %0 = arith.muli %arg0, %c1_i32 : i32
    %1 = arith.addi %0, %arg1 : i32
    %c1_i32_0 = arith.constant 1 : i32
    %2 = arith.minsi %1, %c1_i32_0 : i32
    %c0_i32 = arith.constant 0 : i32
    %c0_i32_1 = arith.constant 0 : i32
    return %2, %c0_i32 : i32, i32
  }
  func.func @transform_1(%arg0: i32, %arg1: i32) -> (i32, i32) {
    %c1_i32 = arith.constant 1 : i32
    %0 = arith.muli %arg0, %c1_i32 : i32
    %1 = arith.addi %0, %arg1 : i32
    %c1_i32_0 = arith.constant 1 : i32
    %2 = arith.minsi %1, %c1_i32_0 : i32
    %c0_i32 = arith.constant 0 : i32
    %c0_i32_1 = arith.constant 0 : i32
    return %2, %c0_i32 : i32, i32
  }
  func.func @transform_2(%arg0: i32, %arg1: i32) -> (i32, i32) {
    %c0_i32 = arith.constant 0 : i32
    %c0_i32_0 = arith.constant 0 : i32
    return %arg0, %c0_i32 : i32, i32
  }
}

</mosaic_0001>

<bundles_post_ra>
// kernel: focal_loss.1
= control target key start
LH: loop header
LB: loop body
LE: loop exit
PB: predicated region body
PF: predicated region fallthrough
CT: control target
= control target key end

     0   :  { %s437_s9 = smov 0   ;;  %s439_s10 = smov 0   ;;  %s497_s0 = inlined_call_operand.vmem [shape: f32[16,128], index: 0, kind: input, shape index: {}]   ;;  %s498_s1 = inlined_call_operand.vmem [shape: f32[16,128], index: 1, kind: input, shape index: {}]   ;;  %s499_s2 = inlined_call_operand.vmem [shape: f32[16,128], index: 2, kind: output, shape index: {}]  }
   0x1   :  { %s441_s11 = smov 0  }
   0x2 LB: > { %s24_s12 = sadd.s32 1, %s415_s10  ;;  %p349_p0 = scmp.ge.s32.totalorder %s419_s11, 1  ;;  %s419_s11 = sphi %s441_s11, %s12_s11   ;;  %s415_s10 = sphi %s439_s10, %s501_s10   ;;  %s411_s9 = sphi %s437_s9, %s500_s9  }
   0x3   : > { %p26_p1 = scmp.ge.s32.totalorder %s24_s12, 2  ;;  %p156_p2 = scmp.lt.s32.totalorder %s419_s11, 3 }
   0x5   : > { %s503_s12 = smov (%p26_p1, %s24_s12), 0  ;;  %p157_p3 = pnand %p349_p0, %p156_p2 }
   0x6   : > { %p187_p4 = scmp.lt.s32.totalorder (!%p157_p3), %s411_s9, 1  ;;  %s359_s13 = sshll.u32 (!%p157_p3), %s411_s9, 10 }
   0x7   : > { %160 = sbr.rel (%p157_p3) target bundleno = 86 (0x56), region = 28  ;;  %s461_s14 = sadd.s32 (!%p157_p3), 1024, %s359_s13 }
   0x8   : > { %p360_p5 = scmp.gt.s32.totalorder (!%p157_p3), %s461_s14, 2048 }
   0xc   : > { %s188_s15 = scalar_select %p187_p4, %s411_s9, 1  ;;  %v421_v0 = vmov 0.0  }
   0xd   : > { %221 = sbr.rel (%p360_p5) target bundleno = 48 (0x30), region = 36 }
   0xe   : > { %s190_s16 = scalar_select %p187_p4, %s188_s15, 1 }
   0xf   : > { %s358_s17 = sshll.u32 %s188_s15, 3 }
  0x10   : > { %s353_s18 = sshll.u32 %s190_s16, 3  ;;  %s467_s21 = scalar_lea.vmem %s499_s2, %s358_s17 }
  0x11   : > { %s192_s24 = scalar_lea.vmem %s497_s0, %s353_s18  ;;  %s475_s27 = scalar_lea.vmem %s498_s1, %s353_s18  ;;  %214 = vst [vmem:[%s467_s21] sm:$0xff] %v421_v0 }
  0x12   : > { %v223_v1 = vld [vmem:[%s192_s24] sm:$0xff] }
  0x13   : > { %389 = vlog2.f32 %v223_v1  ;;  %v228_v2 = vsub.f32 1.0, %v223_v1  ;;  %v224_v9 = vld [vmem:[%s475_s27] sm:$0xff] }
  0x15   : > { %391 = vlog2.f32 %v228_v2 }
  0x18   : > { %v222_v12 = vld [vmem:[%s467_s21] sm:$0xff] }
  0x20   : > { %v390_v3 = vpop.eup %389 }
  0x21   : > { %v226_v4 = vmul.f32 0.6931472, %v390_v3 }
  0x22   : > { %v392_v5 = vpop.eup %391 }
  0x23   : > { %v227_v6 = vmax.f32 %v226_v4, -100.0  ;;  %v230_v7 = vmul.f32 0.6931472, %v392_v5 }
  0x25   : > { %v231_v8 = vmax.f32 %v230_v7, -100.0 }
  0x27   : > { %v232_v10 = vsub.f32 %v227_v6, %v231_v8 }
  0x29   : > { %v233_v11 = vmul.f32 %v232_v10, %v224_v9 }
  0x2b   : > { %v234_v13 = vadd.f32 %v233_v11, %v231_v8 }
  0x2d   : > { %v237_v14 = vadd.f32 %v234_v13, %v222_v12 }
  0x2f   : > { %238 = vst [vmem:[%s467_s21] sm:$0xff] %v237_v14 }
  0x30 PF: > { %p361_p6 = scmp.le.s32.totalorder %s461_s14, 2048 }
  0x32   : > { %242 = sbr.rel (%p361_p6) target bundleno = 86 (0x56), region = 40 }
  0x37   : > { %v250_v15 = vld [vmem:[%s192_s24] sm:$0xff]  ;;  %v244_v17 = vlaneseq  ;;  %v264_v27 = vstv %s359_s13 }
  0x38   : > { %393 = vlog2.f32 %v250_v15  ;;  %v255_v16 = vsub.f32 1.0, %v250_v15  ;;  %v251_v29 = vld [vmem:[%s475_s27] sm:$0xff] }
  0x39   : > { %v245_v18 = vshrl.u32 %v244_v17, 7  ;;  %v248_v20 = vand.u32 127, %v244_v17  ;;  %v243_v33 = vld [vmem:[%s467_s21] sm:$0xff] }
  0x3a   : > { %395 = vlog2.f32 %v255_v16 }
  0x3b   : > { %v246_v19 = vmul.u32 128, %v245_v18 }
  0x3d   : > { %v249_v24 = vadd.s32 %v248_v20, %v246_v19 }
  0x3f   : > { %v265_v30 = vadd.s32 %v264_v27, %v249_v24 }
  0x41   : > { %vm266_vm0 = vcmp.lt.s32.totalorder %v265_v30, 2048 }
  0x45   : > { %v394_v21 = vpop.eup %393 }
  0x46   : > { %v253_v22 = vmul.f32 0.6931472, %v394_v21 }
  0x47   : > { %v396_v23 = vpop.eup %395 }
  0x48   : > { %v254_v25 = vmax.f32 %v253_v22, -100.0  ;;  %v257_v26 = vmul.f32 0.6931472, %v396_v23 }
  0x4a   : > { %v258_v28 = vmax.f32 %v257_v26, -100.0 }
  0x4c   : > { %v259_v31 = vsub.f32 %v254_v25, %v258_v28 }
  0x4e   : > { %v260_v32 = vmul.f32 %v259_v31, %v251_v29 }
  0x50   : > { %v261_v34 = vadd.f32 %v260_v32, %v258_v28 }
  0x52   : > { %v267_v35 = vsel %vm266_vm0, %v261_v34, 0.0 }
  0x53   : > { %v270_v36 = vadd.f32 %v267_v35, %v243_v33 }
  0x55   : > { %271 = vst [vmem:[%s467_s21] sm:$0xff] %v270_v36 }
  0x56 PF: > { %s12_s11 = sadd.s32 1, %s419_s11   ;;  %s500_s9 = smov %s415_s10 }
  0x57   : > { %p9_p7 = scmp.ge.s32.totalorder %s12_s11, 4   ;;  %s501_s10 = smov %s503_s12 }
  0x59   :  { %11 = sbr.rel (!%p9_p7) target bundleno = 2 (0x2), region = 73 }

</bundles_post_ra>
